<compile_context>
chip_gen: v6e
topology: v6e:2x2x1
jax: 0.10.0
libtpu: 0.0.40
codegen_flags: <defaults>
</compile_context>

<pallas_src>
import jax
import jax.numpy as jnp
from jax import lax
from jax.experimental import pallas as pl
from jax.experimental.pallas import tpu as pltpu


# ----------------------------------------------------------------------------
# Generation-aware VMEM sizing.
# ----------------------------------------------------------------------------
_VMEM_CAPS_CACHE = None


def _vmem_caps():
    """Returns (sizing budget, scoped vmem_limit_bytes) derived from the chip."""
    global _VMEM_CAPS_CACHE
    if _VMEM_CAPS_CACHE is None:
        cap = 64 * 1024 * 1024                 # conservative fallback (v7x per-TC)
        try:
            info = pltpu.get_tpu_info()
            q = getattr(info, "vmem_capacity_bytes", None)
            if q:
                cap = int(q)
        except Exception:
            pass
        cap = max(cap, 32 * 1024 * 1024)
        budget = (cap * 5) // 8                # ~62.5% of physical: sizing budget
        limit = (cap * 3) // 4                 # explicit scoped-VMEM limit
        _VMEM_CAPS_CACHE = (budget, limit)
    return _VMEM_CAPS_CACHE


def _whole_slab_vmem_bytes(bb, C, N, itemsize):
    """Live VMEM footprint of one whole-slab grid step (bb batch elements)."""
    blocks = 4 * bb * C * N * itemsize         # in + out blocks, double-buffered
    f32_tmp = 2 * bb * C * N * 4               # f32 matmul result + headroom
    cc_tmp = 3 * bb * C * C * 4                # energy / p / attn f32 temporaries
    return blocks + f32_tmp + cc_tmp


def _streamed_tile_vmem_bytes(C, tile_n, itemsize, attn_itemsize):
    """Live VMEM footprint of one streamed grid step."""
    blocks = 4 * C * tile_n * itemsize         # x tile + out tile, double-buffered
    f32_tmp = 2 * C * tile_n * 4               # phase-1 f32 matmul result + headroom
    scratch = C * C * 4 + C * C * attn_itemsize
    return blocks + f32_tmp + scratch


def _cost_estimate(B, C, N, itemsize, streamed):
    # Two bmm's (2*C*C*N MACs each), exp per energy entry, one recip per row.
    return pl.CostEstimate(
        flops=4 * B * C * C * N,
        transcendentals=B * C * (C + 1),
        bytes_accessed=(3 if streamed else 2) * B * C * N * itemsize,
    )


# ----------------------------------------------------------------------------
# Path 1: whole-slab kernel, several batch elements per grid step.
# ----------------------------------------------------------------------------
def _mc_adapter_whole_slab_kernel(gamma_ref, x_ref, o_ref):
    x = x_ref[...]                                            # (bb, C, N), native dtype
    # Gram matrix over the spatial axis; accumulate in f32 on the MXU.
    # (Both operands contract the lane axis; if the Mosaic dump shows a
    #  per-tile vxpose on the RHS, a channels-last layout would remove it.)
    energy = jnp.einsum('bcn,bdn->bcd', x, x,
                        preferred_element_type=jnp.float32)   # (bb, C, C) f32
    # softmax(rowmax(E) - E) == softmax(rowmin(E) - E): single XLU reduction,
    # exponents stay <= 0 so it remains numerically stable.
    e_min = jnp.min(energy, axis=-1, keepdims=True)
    p = jnp.exp(e_min - energy)
    attn = p * pl.reciprocal(jnp.sum(p, axis=-1, keepdims=True), approx=True)
    out = jnp.einsum('bcd,bdn->bcn', attn.astype(x.dtype), x,
                     preferred_element_type=jnp.float32)      # (bb, C, N) f32
    # Residual add in the native dtype: avoids an x.astype(f32) temporary.
    o_ref[...] = (gamma_ref[0] * out).astype(o_ref.dtype) + x


def _pick_bb(B, C, N, itemsize, budget):
    slab = max(C * N * itemsize, 1)
    # Tiny-C steps are bound by DMA size + ~600-cycle per-step overhead, so
    # move more bytes per grid step there.
    target = (8 if C <= 32 else 4) * 1024 * 1024
    bb = max(1, min(B, target // slab))
    while bb > 1 and _whole_slab_vmem_bytes(bb, C, N, itemsize) > budget:
        bb -= 1
    if B >= 2:
        bb = min(bb, max(1, B // 2))    # keep >= 2 parallel steps (v7x megacore)
    while B % bb != 0:
        bb -= 1
    return bb


def _mc_adapter_whole_slab(x_flat, gamma, B, C, N, budget, limit):
    itemsize = x_flat.dtype.itemsize
    bb = _pick_bb(B, C, N, itemsize, budget)

    return pl.pallas_call(
        _mc_adapter_whole_slab_kernel,
        out_shape=jax.ShapeDtypeStruct((B, C, N), x_flat.dtype),
        grid=(B // bb,),
        in_specs=[
            pl.BlockSpec(memory_space=pltpu.MemorySpace.SMEM),     # gamma (1,)
            pl.BlockSpec((bb, C, N), lambda i: (i, 0, 0)),
        ],
        out_specs=pl.BlockSpec((bb, C, N), lambda i: (i, 0, 0)),
        compiler_params=pltpu.CompilerParams(
            dimension_semantics=("parallel",),
            vmem_limit_bytes=limit,
        ),
        cost_estimate=_cost_estimate(B, C, N, itemsize, streamed=False),
    )(gamma, x_flat)


# ----------------------------------------------------------------------------
# Path 2: two-sweep streamed kernel for large N (VMEM ~ C^2 + a few C x tile_N).
#   sweep 0: accumulate energy (C, C) from lane-dense N tiles
#   sweep 1: softmax once (in place / into a single narrow scratch), then
#            attn @ x_tile per tile -> output tile
# ----------------------------------------------------------------------------
def _make_streamed_kernel(C, row_chunk, separate_attn):
    n_chunks = C // row_chunk

    def softmax_rows(energy_acc, attn_dst):
        # attn_dst is either energy_acc itself (f32, in place) or a single
        # x.dtype scratch (bf16 inputs: attn cast exactly once).
        def one_chunk(r0):
            e = energy_acc[pl.ds(r0, row_chunk), :]
            e_min = jnp.min(e, axis=-1, keepdims=True)
            p = jnp.exp(e_min - e)
            a = p * pl.reciprocal(jnp.sum(p, axis=-1, keepdims=True), approx=True)
            attn_dst[pl.ds(r0, row_chunk), :] = a.astype(attn_dst.dtype)

        if n_chunks == 1:
            one_chunk(0)
        else:
            # Row-chunked so peak f32 temporaries stay a few MiB for large C.
            def body(r, carry):
                one_chunk(pl.multiple_of(r * row_chunk, row_chunk))
                return carry
            lax.fori_loop(0, n_chunks, body, 0)

    def body(gamma_ref, x_ref, o_ref, energy_acc, attn_ref):
        phase = pl.program_id(1)
        j = pl.program_id(2)
        x = x_ref[0]                                           # (C, tile_n)

        @pl.when(phase == 0)
        def _():
            @pl.when(j == 0)
            def _():
                energy_acc[...] = jnp.zeros_like(energy_acc)
            # Partial Gram matrix for this spatial tile (contract the lane axis).
            energy_acc[...] += lax.dot_general(
                x, x, (((1,), (1,)), ((), ())),
                preferred_element_type=jnp.float32)

        @pl.when(phase == 1)
        def _():
            @pl.when(j == 0)
            def _():
                softmax_rows(energy_acc, attn_ref)
            out = jnp.dot(attn_ref[...], x, preferred_element_type=jnp.float32)
            o_ref[0] = (gamma_ref[0] * out).astype(o_ref.dtype) + x

    if separate_attn:
        def kernel(gamma_ref, x_ref, o_ref, energy_acc, attn_ref):
            body(gamma_ref, x_ref, o_ref, energy_acc, attn_ref)
    else:
        def kernel(gamma_ref, x_ref, o_ref, energy_acc):
            body(gamma_ref, x_ref, o_ref, energy_acc, energy_acc)
    return kernel


def _mc_adapter_streamed(x_flat, gamma, B, C, N, tile_n, budget, limit):
    itemsize = x_flat.dtype.itemsize
    separate_attn = x_flat.dtype != jnp.float32
    attn_itemsize = itemsize if separate_attn else 0

    if tile_n is None:
        tile_n = 128
        for cand in (16384, 8192, 4096, 2048, 1024, 512, 256):
            if (N % cand == 0 and
                    _streamed_tile_vmem_bytes(C, cand, itemsize, attn_itemsize)
                    <= budget):
                tile_n = cand
                break
    assert N % tile_n == 0 and tile_n % 128 == 0
    n_tiles = N // tile_n

    # Softmax row-chunk size: whole matrix for modest C, chunked for large C.
    row_chunk = C
    if C > 512:
        for cand in (512, 256, 128, 64):
            if C % cand == 0:
                row_chunk = cand
                break

    kernel = _make_streamed_kernel(C, row_chunk, separate_attn)
    scratch = [pltpu.VMEM((C, C), jnp.float32)]        # energy accumulator
    if separate_attn:
        scratch.append(pltpu.VMEM((C, C), x_flat.dtype))  # attn (cast once)

    # NOTE: on v5e (lowest HBM BW) pipeline_mode=pl.Buffered(3) on the x-tile
    # spec would further hide per-tile fetch latency; omitted here to keep one
    # portable code path.
    return pl.pallas_call(
        kernel,
        out_shape=jax.ShapeDtypeStruct((B, C, N), x_flat.dtype),
        grid=(B, 2, n_tiles),
        in_specs=[
            pl.BlockSpec(memory_space=pltpu.MemorySpace.SMEM),          # gamma (1,)
            pl.BlockSpec((1, C, tile_n), lambda b, p, j: (b, 0, j)),    # x tile
        ],
        # Sweep 0 never writes the output: park the output index on block
        # (b, 0) during phase 0 so each output tile is DMA'd back to HBM
        # exactly once, only after phase 1 produces it (writeback happens on
        # block-index change, same mechanism as the accumulator pattern).
        out_specs=pl.BlockSpec((1, C, tile_n), lambda b, p, j: (b, 0, j * p)),
        scratch_shapes=scratch,
        compiler_params=pltpu.CompilerParams(
            dimension_semantics=("parallel", "arbitrary", "arbitrary"),
            vmem_limit_bytes=limit,
        ),
        cost_estimate=_cost_estimate(B, C, N, itemsize, streamed=True),
    )(gamma, x_flat)


# ----------------------------------------------------------------------------
# Public wrapper
# ----------------------------------------------------------------------------
def mc_adapter(x, gamma, *, force_streamed=False, tile_n=None):
    """x: (B, C, H, W), gamma: (1,) f32 (the nn.Parameter)."""
    B, C, H, W = x.shape
    N = H * W
    x_flat = x.reshape(B, C, N)
    itemsize = x_flat.dtype.itemsize
    budget, limit = _vmem_caps()

    use_streamed = (force_streamed or
                    _whole_slab_vmem_bytes(1, C, N, itemsize) > budget)
    if use_streamed and N % 128 != 0:
        # TODO(synk): ragged-N streaming would need masked tiles; fall back to
        # the whole-slab path (single batch element per step) for such shapes.
        use_streamed = False

    if use_streamed:
        out_flat = _mc_adapter_streamed(x_flat, gamma, B, C, N, tile_n,
                                        budget, limit)
    else:
        out_flat = _mc_adapter_whole_slab(x_flat, gamma, B, C, N, budget, limit)
    return out_flat.reshape(B, C, H, W)


def mc_adapter_ref(x, gamma):
    """Pure-JAX reference mirroring the PyTorch forward exactly."""
    B, C, H, W = x.shape
    xf = x.reshape(B, C, H * W)
    energy = jnp.einsum('bcn,bdn->bcd', xf, xf)
    energy_new = jnp.max(energy, axis=-1, keepdims=True) - energy
    attn = jax.nn.softmax(energy_new, axis=-1)
    out = jnp.einsum('bcd,bdn->bcn', attn, xf).reshape(B, C, H, W)
    return gamma[0] * out + x


if __name__ == "__main__":
    key = jax.random.PRNGKey(0)
    k1, k2 = jax.random.split(key)

    # nn.Parameter(torch.zeros(1)) has shape (1,). Zero makes out == x, so use
    # a deterministic nonzero value to exercise the attention path.
    gamma = jnp.full((1,), 0.5, dtype=jnp.float32)

    # Small shape from the spec: exercises the whole-slab path.
    B, C, H, W = 2, 4, 16, 16
    x_small = jax.random.normal(k1, (B, C, H, W), dtype=jnp.float32)
    out_small = mc_adapter(x_small, gamma)
    jax.block_until_ready(out_small)
    ref_small = mc_adapter_ref(x_small, gamma)
    assert out_small.shape == (B, C, H, W)
    # approx reciprocal + f32-accumulated matmuls: tolerance looser than 1e-5.
    assert jnp.allclose(out_small, ref_small, atol=1e-2, rtol=1e-2), "whole-slab mismatch"

    # Slightly larger shape forced through the streamed two-sweep path so the
    # VMEM-bounded code path (multiple N tiles) is exercised on TPU as well.
    B2, C2, H2, W2 = 2, 8, 32, 32
    x_big = jax.random.normal(k2, (B2, C2, H2, W2), dtype=jnp.float32)
    out_big = mc_adapter(x_big, gamma, force_streamed=True, tile_n=256)
    jax.block_until_ready(out_big)
    ref_big = mc_adapter_ref(x_big, gamma)
    assert out_big.shape == (B2, C2, H2, W2)
    assert jnp.allclose(out_big, ref_big, atol=1e-2, rtol=1e-2), "streamed mismatch"

    print("KERNEL_OK")
</pallas_src>

<mosaic_0001>
module attributes {stable_mosaic.version = 11 : i64} {
  func.func @_mc_adapter_whole_slab_kernel(%arg0: i32, %arg1: memref<1xf32, #tpu.memory_space<smem>>, %arg2: memref<1x4x256xf32, #tpu.memory_space<vmem>>, %arg3: memref<1x4x256xf32, #tpu.memory_space<vmem>>) attributes {dimension_semantics = [#tpu.dimension_semantics<parallel>], iteration_bounds = array<i64: 2>, scalar_prefetch = 0 : i64, scratch_operands = 0 : i64, tpu.core_type = #tpu.core_type<tc>, window_params = [{transform_indices = @transform_0, window_bounds = array<i64: 1>}, {transform_indices = @transform_1, window_bounds = array<i64: 1, 4, 256>}, {transform_indices = @transform_2, window_bounds = array<i64: 1, 4, 256>}]} {
    %c0 = arith.constant 0 : index
    %c0_0 = arith.constant 0 : index
    %c0_1 = arith.constant 0 : index
    %0 = vector.load %arg2[%c0, %c0_0, %c0_1] : memref<1x4x256xf32, #tpu.memory_space<vmem>>, vector<1x4x256xf32>
    "tpu.trace_start"() <{level = 10 : i32, message = "bcn,bdn->bcd"}> : () -> ()
    %cst = arith.constant dense<0.000000e+00> : vector<1x4x4xf32>
    %1 = tpu.matmul %0, %0, %cst {dimension_numbers = #tpu.dot_dimension_numbers<[2], [2], [1], [1], [0, 0, 0, 1, 1, 1], [0], [0]>} : vector<1x4x256xf32>, vector<1x4x256xf32>, vector<1x4x4xf32> -> vector<1x4x4xf32>
    "tpu.trace_stop"() : () -> ()
    %cst_2 = arith.constant dense<0x7F800000> : vector<1x4xf32>
    %2 = vector.multi_reduction <minimumf>, %1, %cst_2 [2] : vector<1x4x4xf32> to vector<1x4xf32>
    %3 = vector.shape_cast %2 : vector<1x4xf32> to vector<1x4x1xf32>
    %4 = vector.broadcast %3 : vector<1x4x1xf32> to vector<1x4x4xf32>
    %5 = arith.subf %4, %1 : vector<1x4x4xf32>
    %6 = math.exp %5 : vector<1x4x4xf32>
    %cst_3 = arith.constant dense<0.000000e+00> : vector<1x4xf32>
    %7 = vector.multi_reduction <add>, %6, %cst_3 [2] : vector<1x4x4xf32> to vector<1x4xf32>
    %8 = vector.shape_cast %7 : vector<1x4xf32> to vector<1x4x1xf32>
    %9 = tpu.reciprocal %8 {approx = true} : vector<1x4x1xf32> -> vector<1x4x1xf32>
    %10 = vector.broadcast %9 : vector<1x4x1xf32> to vector<1x4x4xf32>
    %11 = arith.mulf %6, %10 : vector<1x4x4xf32>
    "tpu.trace_start"() <{level = 10 : i32, message = "bcd,bdn->bcn"}> : () -> ()
    %cst_4 = arith.constant dense<0.000000e+00> : vector<1x4x256xf32>
    %12 = tpu.matmul %11, %0, %cst_4 {dimension_numbers = #tpu.dot_dimension_numbers<[2], [1], [1], [2], [0, 0, 0, 1, 1, 2], [0], [0]>} : vector<1x4x4xf32>, vector<1x4x256xf32>, vector<1x4x256xf32> -> vector<1x4x256xf32>
    "tpu.trace_stop"() : () -> ()
    %c0_5 = arith.constant 0 : index
    %13 = memref.load %arg1[%c0_5] : memref<1xf32, #tpu.memory_space<smem>>
    %14 = vector.broadcast %13 : f32 to vector<1x4x256xf32>
    %15 = arith.mulf %14, %12 : vector<1x4x256xf32>
    %16 = arith.addf %15, %0 : vector<1x4x256xf32>
    %c0_6 = arith.constant 0 : index
    %c0_7 = arith.constant 0 : index
    %c0_8 = arith.constant 0 : index
    %17 = vector.load %arg3[%c0_6, %c0_7, %c0_8] : memref<1x4x256xf32, #tpu.memory_space<vmem>>, vector<1x4x256xf32>
    tpu.vector_store %arg3[%c0_6, %c0_7, %c0_8], %16 {strides = array<i32>} : memref<1x4x256xf32, #tpu.memory_space<vmem>>, vector<1x4x256xf32>,
    return
  }
  func.func @transform_0(%arg0: i32) -> i32 {
    %c0_i32 = arith.constant 0 : i32
    %c0_i32_0 = arith.constant 0 : i32
    return %c0_i32 : i32
  }
  func.func @transform_1(%arg0: i32) -> (i32, i32, i32) {
    %c0_i32 = arith.constant 0 : i32
    %c0_i32_0 = arith.constant 0 : i32
    %c0_i32_1 = arith.constant 0 : i32
    return %arg0, %c0_i32, %c0_i32_0 : i32, i32, i32
  }
  func.func @transform_2(%arg0: i32) -> (i32, i32, i32) {
    %c0_i32 = arith.constant 0 : i32
    %c0_i32_0 = arith.constant 0 : i32
    %c0_i32_1 = arith.constant 0 : i32
    return %arg0, %c0_i32, %c0_i32_0 : i32, i32, i32
  }
}

</mosaic_0001>

<bundles_post_ra>
// kernel: tpu_custom_call.1
= control target key start
LH: loop header
LB: loop body
LE: loop exit
PB: predicated region body
PF: predicated region fallthrough
CT: control target
= control target key end

     0   :  { %s754_s0 = inlined_call_operand.<no memory space> [shape: f32[1], index: 0, kind: input, shape index: {}]   ;;  %s755_s1 = inlined_call_operand.hbm [shape: f32[2,4,256], index: 1, kind: input, shape index: {}]   ;;  %s756_s2 = inlined_call_operand.hbm [shape: f32[2,4,256], index: 2, kind: output, shape index: {}]  }
   0x1   :  { %7 = sst [smem:[#allocation2]] %s754_s0 }
   0x2   :  { %8 = vsyncpa [#allocation4], 0 }
   0x3   :  { %10 = vsyncpa [#allocation4 + $0x1], 0 }
   0x4   :  { %11 = vsyncpa [#allocation5], 0 }
   0x5   :  { %13 = vsyncpa [#allocation5 + $0x1], 0  ;;  %s609_s11 = smov 0   ;;  %s611_s12 = smov 0  }
   0x6   :  { %s613_s13 = smov 0   ;;  %s615_s14 = smov 0  }
   0x7 LB: > { %s630_s0 = sadd.s32 4294967295, %s586_s14   ;;  %s423_s15 = sadd.s32 4294967294, %s586_s14   ;;  %s586_s14 = sphi %s615_s14, %s773_s14   ;;  %s582_s13 = sphi %s613_s13, %s772_s13   ;;  %s578_s12 = sphi %s611_s12, %s771_s12   ;;  %s574_s11 = sphi %s609_s11, %s770_s11  }
   0x8   : > { %s634_s16 = sadd.s32 1, %s586_s14   ;;  %s47_s17 = sadd.s32 1, %s582_s13 }
   0x9   : > { %s44_s18 = ssub.s32 %s586_s14, %s634_s16  ;;  %p54_p0 = scmp.ne.s32.totalorder %s582_s13, %s578_s12 }
   0xa   : > { %p45_p1 = scmp.eq.s32.totalorder %s44_s18, 0  ;;  %p55_p2 = scmp.eq.s32.totalorder %s586_s14, 0 }
   0xb   : > { %p60_p3 = scmp.ne.s32.totalorder %s578_s12, %s574_s11  ;;  %p61_p4 = scmp.eq.s32.totalorder %s630_s0, 0 }
   0xc   : > { %s646_s19 = scalar_select %p45_p1, %s582_s13, %s47_s17  }
   0xd   : > { %p648_p5 = por %p55_p2, %p54_p0  ;;  %p652_p6 = por %p61_p4, %p60_p3 }
   0xe   : > { %p84_p7 = scmp.eq.s32.totalorder %s630_s0, 1  ;;  %p90_p8 = scmp.eq.s32.totalorder %s423_s15, 1 }
   0xf   : > { %s760_s21 = scalar_select %p652_p6, 1, 0 }
  0x10   : > { %p454_p10 = scmp.lt.s32.totalorder %s586_s14, 2  ;;  %p659_p11 = por %p84_p7, %p54_p0 }
  0x11   : > { %p663_p12 = por %p90_p8, %p60_p3  ;;  %s113_s24 = sand.u32 1, %s582_s13  }
  0x12   : > { %s761_s22 = scalar_select %p659_p11, 1, 0 }
  0x13   : > { %s762_s23 = scalar_select %p663_p12, 1, 0 }
  0x14   : > { %s440_s25 = sshll.u32 %s586_s14, 7  ;;  %s426_s26 = sshll.u32 %s113_s24, 3 }
  0x15   : > { %s672_s29 = scalar_lea.hbm %s755_s1, %s440_s25  ;;  %s117_s30 = scalar_lea.vmem [#allocation3], %s426_s26 }
  0x16   : > { %s125_s3 = sshll.u32 %s117_s30, 4  ;;  %p676_p13 = pnand %p454_p10, %p648_p5  ;;  %s680_s3 = int_to_ptr.vmem [resolvable:$true] %s125_s3 }
  0x17   : > { %s114_s5 = scalar_lea.sflag [#allocation4], %s113_s24  ;;  %s494_s6 = scalar_lea.hbm %s672_s29, 128 }
  0x18   : > { %p495_p2 = scmp.ne.s32.totalorder %s672_s29, %s494_s6  ;;  %p496_p3 = pneg %p676_p13 }
  0x19   : > { %s499_s9 = scalar_lea.hbm %s755_s1, 256  ;;  %p500_p5 = scmp.lt.s32.totalorder %s672_s29, %s755_s1 }
  0x1a   : > { %p497_p4 = pnand %p496_p3, %p495_p2  ;;  %p501_p8 = scmp.lt.s32.totalorder %s499_s9, %s494_s6 }
  0x1c   : > { %p498_p7 = pneg %p497_p4  ;;  %p502_p10 = por %p501_p8, %p500_p5 }
  0x1e   : > { %p503_p9 = pnand %p502_p10, %p498_p7 }
  0x20   : > { %506 = shalt.err (!%p503_p9)
}
  0x21   : > { %s507_s17 = scalar_lea.vmem %s680_s3, 128  ;;  %s588_s18 = smov [#allocation3]  }
  0x22   : > { %p508_p0 = scmp.ne.s32.totalorder %s680_s3, %s507_s17  ;;  %s512_s20 = sshll.u32 %s588_s18, 4  ;;  %s513_s20 = int_to_ptr.vmem [resolvable:$false] %s512_s20 }
  0x23   : > { %s514_s24 = scalar_lea.vmem %s513_s20, 256  ;;  %p515_p4 = scmp.lt.s32.totalorder %s680_s3, %s513_s20 }
  0x24   : > { %p510_p1 = pnand %p508_p0, %p496_p3  ;;  %p516_p12 = scmp.lt.s32.totalorder %s514_s24, %s507_s17 }
  0x26   : > { %p511_p2 = pneg %p510_p1  ;;  %p517_p11 = por %p516_p12, %p515_p4 }
  0x28   : > { %p518_p6 = pnand %p517_p11, %p511_p2 }
  0x2a   : > { %521 = shalt.err (!%p518_p6)
}
  0x2b   : > { %449 = dma.hbm_to_vmem [thread:$0]  (!%p676_p13), %s672_s29, 128, %s680_s3, %s114_s5  }
  0x2c   : > { %p764_p9 = scmp.lt.s32.totalorder %s586_s14, 3  ;;  %p765_p7 = scmp.ge.s32.totalorder %s586_s14, 1 }
  0x2e   : > { %p131_p0 = pnand %p765_p7, %p764_p9 }
  0x2f   : > { %s707_s25 = sand.u32 (!%p131_p0), 1, %s578_s12   ;;  %p766_p6 = scmp.ne.s32.totalorder (!%p131_p0), %s760_s21, 0 }
  0x30   : > { %134 = sbr.rel (%p131_p0) target bundleno = 780 (0x30c), region = 28  ;;  %s430_s26 = sshll.u32 (!%p131_p0), %s707_s25, 3 }
  0x31   : > { %s137_s27 = scalar_lea.sflag (!%p131_p0), [#allocation4], %s707_s25  ;;  %s140_s28 = scalar_lea.vmem (!%p131_p0), [#allocation3], %s430_s26 }
  0x35   : > { %565 = dma.done.wait (%p766_p6), %s137_s27, 128  }
  0x36   : > { %567 = vsyncadd (%p766_p6), %s137_s27, 4294967168  ;;  %v161_v0 = vld [vmem:[%s140_s28] sm:$0xff]  ;;  %vm235_vm0 = vcmask 27648   ;;  %vm251_vm1 = vcmask 1043456   ;;  %v589_v10 = vmov 0.0   ;;  %vm247_vm2 = vcmask 31744  }
  0x37   : > { %v163_v1 = vcombine.high %v161_v0, %v161_v0  ;;  %320 = vmatprep.mubr.f32.mxu1 %v589_v10  ;;  %s327_s21 = sld [smem:[#allocation2]]  ;;  %s441_s29 = sshll.u32 %s630_s0, 7 }
  0x38   : > { %s160_s30 = scalar_lea.vmem [#allocation6], %s430_s26  ;;  %s351_s6 = scalar_lea.hbm %s756_s2, %s441_s29 }
  0x39   : > { %195 = vmatprep.subr.mxu0 %v163_v1  ;;  %229 = vmatprep.mubr.f32.mxu0 %v163_v1  ;;  %s353_s3 = sshll.u32 %s160_s30, 4  ;;  %s339_s7 = scalar_lea.sflag [#allocation5], %s707_s25  ;;  %s354_s3 = int_to_ptr.vmem [resolvable:$true] %s353_s3 }
  0x3a   : > { %196 = vmatpush1.xpose.msra.mxu0 %v161_v0  ;;  %432 = vmatprep.subr.msk.mxu1 %vm251_vm1, %v163_v1  ;;  %s522_s8 = scalar_lea.vmem %s354_s3, 128  ;;  %p767_p12 = scmp.ne.s32.totalorder %s761_s22, 0 }
  0x3b   : > { %433 = vmatpush1.msk.msra.mxu1 %vm251_vm1, %v161_v0  ;;  %p523_p11 = scmp.ne.s32.totalorder %s354_s3, %s522_s8  ;;  %s590_s9 = smov [#allocation6]  }
  0x3c   : > { %s526_s0 = sshll.u32 %s590_s9, 4  ;;  %s527_s0 = int_to_ptr.vmem [resolvable:$false] %s526_s0 }
  0x3d   : > { %230 = vmatmul.mubr.f32.vlgmr.msra.gmra.mxu0 %v161_v0  ;;  %v328_v14 = vstv %s327_s21  ;;  %p524_p13 = pnand %p523_p11, %p767_p12  ;;  %s528_s10 = scalar_lea.vmem %s527_s0, 256 }
  0x3e   : > { %p529_p3 = scmp.lt.s32.totalorder %s354_s3, %s527_s0  ;;  %p530_p5 = scmp.lt.s32.totalorder %s528_s10, %s522_s8 }
  0x3f   : > { %p525_p1 = pneg %p524_p13 }
  0x40   : > { %p531_p8 = por %p530_p5, %p529_p3 }
  0x42   : > { %p532_p10 = pnand %p531_p8, %p525_p1 }
  0xfd   : > { %v231_v2 = vpop.f32.mrf.mxu0 }
  0xfe   : > { %v236_v3 = vsel %vm235_vm0, %v231_v2, inf }
  0xff   : > { %237 = vmin.xlane.f32.xlu0 %v236_v3  ;;  %v233_v4 = vpop.f32.mrf.mxu0 }
 0x188   : > { %v238_v5 = vpop.xlane.xlu0 %237 }
 0x189   : > { %v239_v6 = vsub.f32 %v238_v5, %v231_v2 }
 0x18b   : > { %v240_v7 = vmul.f32 1.442695, %v239_v6 }
 0x18d   : > { %490 = vpow2.f32 %v240_v7 }
 0x19a   : > { %v491_v8 = vpop.eup %490 }
 0x19b   : > { %v242_v9 = vsel %vm235_vm0, %v491_v8, 0.0 }
 0x19c   : > { %243 = vadd.xlane.f32.xlu0 %v242_v9 }
 0x225   : > { %v244_v11 = vpop.xlane.xlu0 %243 }
 0x226   : > { %492 = vrcp.f32 %v244_v11 }
 0x233   : > { %v493_v12 = vpop.eup %492 }
 0x234   : > { %v246_v13 = vmul.f32 %v493_v12, %v491_v8 }
 0x236   : > { %434 = vmatmul.mubr.msk.f32.vlgmr.msra.gmra.mxu1 %vm247_vm2, %v246_v13 }
 0x2f6   : > { %v322_v15 = vpop.f32.mrf.mxu1 }
 0x2f7   : > { %v329_v16 = vmul.f32 %v328_v14, %v322_v15 }
 0x2f8   : > { %v324_v17 = vpop.f32.mrf.mxu1 }
 0x2f9   : > { %v330_v18 = vmul.f32 %v328_v14, %v324_v17  ;;  %v331_v19 = vadd.f32 %v329_v16, %v161_v0 }
 0x2fb   : > { %v332_v20 = vadd.f32 %v330_v18, %v163_v1 }
 0x2fd   : > { %v335_v21 = vcombine.low %v331_v19, %v332_v20 }
 0x2ff   : > { %337 = vst [vmem:[%s160_s30] sm:$0xff] %v335_v21 }
 0x300   : > { %535 = shalt.err (!%p532_p10)
}
 0x301   : > { %s536_s15 = scalar_lea.hbm %s351_s6, 128  ;;  %s540_s20 = scalar_lea.hbm %s756_s2, 256 }
 0x302   : > { %p537_p2 = scmp.ne.s32.totalorder %s351_s6, %s536_s15  ;;  %p541_p7 = scmp.lt.s32.totalorder %s351_s6, %s756_s2 }
 0x303   : > { %p542_p0 = scmp.lt.s32.totalorder %s540_s20, %s536_s15 }
 0x304   : > { %p538_p4 = pnand %p537_p2, %p767_p12 }
 0x305   : > { %p543_p6 = por %p542_p0, %p541_p7 }
 0x306   : > { %p539_p9 = pneg %p538_p4 }
 0x308   : > { %p544_p11 = pnand %p543_p6, %p539_p9 }
 0x30a   : > { %547 = shalt.err (!%p544_p11)
}
 0x30b   : > { %444 = dma.vmem_to_hbm [thread:$0]  (%p767_p12), %s354_s3, 128, %s351_s6, %s339_s7  }
 0x30c PF: > { %s365_s26 = sand.u32 1, %s574_s11   ;;  %p768_p13 = scmp.ne.s32.totalorder %s762_s23, 0 }
 0x30d   : > { %p769_p1 = scmp.ge.s32.totalorder %s586_s14, 2  ;;  %s366_s27 = scalar_lea.sflag [#allocation5], %s365_s26 }
 0x30f   : > { %p451_p3 = pnand %p769_p1, %p768_p13 }
 0x311   : > { %p452_p5 = pneg %p451_p3 }
 0x313   : > { %569 = dma.done.wait (%p452_p5), %s366_s27, 128  }
 0x314   : > { %571 = vsyncadd (%p452_p5), %s366_s27, 4294967168  ;;  %p16_p8 = scmp.ge.s32.totalorder %s634_s16, 4   ;;  %s770_s11 = smov %s578_s12 }
 0x315   : > { %s771_s12 = smov %s582_s13  ;;  %s772_s13 = smov %s646_s19 }
 0x316   : > { %s773_s14 = smov %s634_s16  ;;  %18 = sbr.rel (!%p16_p8) target bundleno = 7 (0x7), region = 73 }
 0x31b   :  { %371 = vsyncpa [#allocation4], 1 }
 0x31c   :  { %373 = vsyncpa [#allocation4 + $0x1], 1 }
 0x31d   :  { %374 = vsyncpa [#allocation5], 1 }
 0x31e   :  { %376 = vsyncpa [#allocation5 + $0x1], 1 }

</bundles_post_ra>
